<compile_context>
chip_gen: v6e
topology: v6e:2x2x1
jax: 0.10.0
libtpu: 0.0.40
codegen_flags: <defaults>
</compile_context>

<pallas_src>
import math

import jax
import jax.numpy as jnp
from jax.experimental import pallas as pl
from jax.experimental.pallas import tpu as pltpu

# ----- model config (small, consistent with LlamaArgs) -----
MODEL_DIM = 32
NUM_HEADS = 4
NUM_KV_HEADS = 2
HEAD_DIM = MODEL_DIM // NUM_HEADS           # 8
KV_REPEATS = NUM_HEADS // NUM_KV_HEADS      # 2
CONTEXT_LEN = 8
BATCH = 2


def mha_kernel(x_ref, wbase_ref, wrot_ref, cos_ref, sin_ref, wo_ref, o_ref):
    """Whole problem in one invocation (B*S = 16 rows).

    x_ref     : (B*S, D)       flattened activations
    wbase_ref : (D, 3*H*hd)    [wq*scale | wk_tiled | wv_tiled]
    wrot_ref  : (D, 3*H*hd)    [wq_rot   | wk_rot_tiled | zeros]   (RoPE rotation folded)
    cos_ref   : (B*S, 3*H*hd)  [cos_q | cos_k | ones]
    sin_ref   : (B*S, 3*H*hd)  [sin_q | sin_k | zeros]
    wo_ref    : (H*hd, D)      output projection
    o_ref     : (B*S, D)       output
    """
    B, S, H, hd = BATCH, CONTEXT_LEN, NUM_HEADS, HEAD_DIM
    W = H * hd

    x = x_ref[...]                                                     # (B*S, D)

    # Fused projections: two wide MXU pushes + one elementwise RoPE FMA.
    qkv = (jnp.dot(x, wbase_ref[...], preferred_element_type=jnp.float32) * cos_ref[...]
           + jnp.dot(x, wrot_ref[...], preferred_element_type=jnp.float32) * sin_ref[...])

    # Leading-dim split reshapes are free (row-major, lane dim untouched).
    q = qkv[:, 0 * W:1 * W].reshape(B, S, W)                           # (B, S, H*hd)
    k = qkv[:, 1 * W:2 * W].reshape(B, S, W)                           # GQA repeat already folded
    v = qkv[:, 2 * W:3 * W].reshape(B, S, W)

    # Causal mask, built once, batched shape.
    row = jax.lax.broadcasted_iota(jnp.int32, (B, S, S), 1)
    col = jax.lax.broadcasted_iota(jnp.int32, (B, S, S), 2)
    causal = col <= row

    heads = []
    for h in range(H):                       # 4 static iterations, each batched over B
        qh = q[:, :, h * hd:(h + 1) * hd]                              # (B, S, hd)
        kh = k[:, :, h * hd:(h + 1) * hd]
        vh = v[:, :, h * hd:(h + 1) * hd]

        # 1/sqrt(hd) already folded into W_base; contract last dims (no explicit .T).
        s = jnp.einsum('bqd,bkd->bqk', qh, kh,
                       preferred_element_type=jnp.float32)             # (B, S, S)
        s = jnp.where(causal, s, -1e30)
        m = jnp.max(s, axis=-1, keepdims=True)
        p = jnp.exp(s - m)
        p = p / jnp.sum(p, axis=-1, keepdims=True)                     # exact divide
        heads.append(jnp.einsum('bqk,bkd->bqd', p, vh,
                                preferred_element_type=jnp.float32))   # (B, S, hd)

    # Single lane-axis concat, then one full-width output projection.
    attn = jnp.concatenate(heads, axis=-1).reshape(B * S, W)           # (B*S, H*hd)
    o_ref[...] = jnp.dot(attn, wo_ref[...], preferred_element_type=jnp.float32)


def prepare_params(wq, wk, wv, wo, freqs_cos, freqs_sin, batch):
    """One-time host-side weight/table preparation (not in the hot path)."""
    D, H, KV, hd = MODEL_DIM, NUM_HEADS, NUM_KV_HEADS, HEAD_DIM
    rep = H // KV
    W = H * hd

    # Pair-rotation matrix R: (t @ R)[2j] = -t[2j+1], (t @ R)[2j+1] = t[2j]
    rot = jnp.zeros((hd, hd), jnp.float32)
    idx = jnp.arange(hd // 2)
    rot = rot.at[2 * idx + 1, 2 * idx].set(-1.0)
    rot = rot.at[2 * idx, 2 * idx + 1].set(1.0)

    def fold_rot(w):  # fold the per-head block-diagonal rotation into (D, H*hd) weights
        return jnp.einsum('dhi,ij->dhj', w.reshape(D, H, hd), rot).reshape(D, W)

    scale = 1.0 / math.sqrt(hd)
    wq_s = wq.astype(jnp.float32) * scale                              # fold 1/sqrt(hd)
    # GQA: pre-tile K/V weights to all H heads (head h uses kv head h // rep).
    wk_t = jnp.repeat(wk.astype(jnp.float32).reshape(D, KV, hd), rep, axis=1).reshape(D, W)
    wv_t = jnp.repeat(wv.astype(jnp.float32).reshape(D, KV, hd), rep, axis=1).reshape(D, W)

    w_base = jnp.concatenate([wq_s, wk_t, wv_t], axis=1)                           # (D, 3*H*hd)
    w_rot = jnp.concatenate([fold_rot(wq_s), fold_rot(wk_t),
                             jnp.zeros((D, W), jnp.float32)], axis=1)              # (D, 3*H*hd)

    # RoPE tables expanded to full head_dim ([c0,c0,c1,c1,...]), tiled to heads & batch;
    # the V third uses cos=1 / sin=0 so V passes through untouched.
    cos_full = jnp.repeat(freqs_cos, 2, axis=-1).astype(jnp.float32)               # (S, hd)
    sin_full = jnp.repeat(freqs_sin, 2, axis=-1).astype(jnp.float32)
    S = cos_full.shape[0]
    cos_row = jnp.concatenate([jnp.tile(cos_full, (1, H)), jnp.tile(cos_full, (1, H)),
                               jnp.ones((S, W), jnp.float32)], axis=1)
    sin_row = jnp.concatenate([jnp.tile(sin_full, (1, H)), jnp.tile(sin_full, (1, H)),
                               jnp.zeros((S, W), jnp.float32)], axis=1)
    cos_tab = jnp.tile(cos_row, (batch, 1))                                        # (B*S, 3*H*hd)
    sin_tab = jnp.tile(sin_row, (batch, 1))

    return w_base, w_rot, cos_tab, sin_tab, wo.astype(jnp.float32)


@jax.jit
def multihead_attention(x, w_base, w_rot, cos_tab, sin_tab, wo):
    B, S, D = x.shape
    x2 = x.reshape(B * S, D)      # lane-friendly flat slab; row-major, free reshape

    def full(a):
        return pl.BlockSpec(a.shape, lambda i: (0,) * a.ndim)

    out = pl.pallas_call(
        mha_kernel,
        out_shape=jax.ShapeDtypeStruct((B * S, D), jnp.float32),
        grid_spec=pltpu.PrefetchScalarGridSpec(
            num_scalar_prefetch=0,
            grid=(1,),   # single step: whole (tiny) problem in one invocation
            in_specs=[full(x2), full(w_base), full(w_rot),
                      full(cos_tab), full(sin_tab), full(wo)],
            out_specs=pl.BlockSpec((B * S, D), lambda i: (0, 0)),
            scratch_shapes=[],
        ),
        compiler_params=pltpu.CompilerParams(
            dimension_semantics=("arbitrary",)),
    )(x2, w_base, w_rot, cos_tab, sin_tab, wo)
    return out.reshape(B, S, D)


# ------------------ pure-JAX reference (for correctness check) ------------------
def reference(x, wq, wk, wv, wo, freqs_cos, freqs_sin):
    B, S, D = x.shape
    H, KV, hd = NUM_HEADS, NUM_KV_HEADS, HEAD_DIM
    q = (x @ wq).reshape(B, S, H, hd)
    k = (x @ wk).reshape(B, S, KV, hd)
    v = (x @ wv).reshape(B, S, KV, hd)

    def rope(t):
        tr, ti = t[..., 0::2], t[..., 1::2]
        c = freqs_cos[None, :, None, :]
        s = freqs_sin[None, :, None, :]
        o_r = tr * c - ti * s
        o_i = tr * s + ti * c
        return jnp.stack([o_r, o_i], axis=-1).reshape(t.shape)

    q, k = rope(q), rope(k)
    k = jnp.repeat(k, H // KV, axis=2)
    v = jnp.repeat(v, H // KV, axis=2)
    q, k, v = (t.transpose(0, 2, 1, 3) for t in (q, k, v))
    s = q @ k.transpose(0, 1, 3, 2) / math.sqrt(hd)
    mask = jnp.where(jnp.triu(jnp.ones((S, S), bool), 1), -jnp.inf, 0.0)
    s = s + mask
    p = jax.nn.softmax(s, axis=-1)
    o = (p @ v).transpose(0, 2, 1, 3).reshape(B, S, H * hd)
    return o @ wo


def precompute_freqs(head_dim, seq_len, theta=10000.0):
    freqs = 1.0 / (theta ** (jnp.arange(0, head_dim, 2, dtype=jnp.float32) / head_dim))
    t = jnp.arange(seq_len, dtype=jnp.float32)
    freqs = jnp.outer(t, freqs)                  # (seq_len, head_dim//2)
    return jnp.cos(freqs), jnp.sin(freqs)


if __name__ == "__main__":
    key = jax.random.PRNGKey(0)
    kx, kq, kk, kvk, ko = jax.random.split(key, 5)

    x = jax.random.normal(kx, (BATCH, CONTEXT_LEN, MODEL_DIM), jnp.float32)
    # weights stored as (in_dim, out_dim) == PyTorch weight.T
    scale = 1.0 / math.sqrt(MODEL_DIM)
    wq = jax.random.uniform(kq, (MODEL_DIM, NUM_HEADS * HEAD_DIM),
                            jnp.float32, -scale, scale)
    wk = jax.random.uniform(kk, (MODEL_DIM, NUM_KV_HEADS * HEAD_DIM),
                            jnp.float32, -scale, scale)
    wv = jax.random.uniform(kvk, (MODEL_DIM, NUM_KV_HEADS * HEAD_DIM),
                            jnp.float32, -scale, scale)
    wo = jax.random.uniform(ko, (NUM_HEADS * HEAD_DIM, MODEL_DIM),
                            jnp.float32, -scale, scale)

    freqs_cos, freqs_sin = precompute_freqs(HEAD_DIM, CONTEXT_LEN)

    # One-time host-side preparation (rotation + scale + GQA repeat folded into fused weights).
    params = prepare_params(wq, wk, wv, wo, freqs_cos, freqs_sin, BATCH)

    out = multihead_attention(x, *params)
    out = jax.block_until_ready(out)

    ref = reference(x, wq, wk, wv, wo, freqs_cos, freqs_sin)
    assert out.shape == (BATCH, CONTEXT_LEN, MODEL_DIM)
    # exact softmax division in-kernel -> tight tolerance
    assert jnp.allclose(out, ref, atol=1e-4, rtol=1e-4), "mismatch vs reference"

    print("KERNEL_OK")
</pallas_src>

<mosaic_0001>
module attributes {stable_mosaic.version = 11 : i64} {
  func.func @mha_kernel(%arg0: i32, %arg1: memref<16x32xf32, #tpu.memory_space<vmem>>, %arg2: memref<32x96xf32, #tpu.memory_space<vmem>>, %arg3: memref<32x96xf32, #tpu.memory_space<vmem>>, %arg4: memref<16x96xf32, #tpu.memory_space<vmem>>, %arg5: memref<16x96xf32, #tpu.memory_space<vmem>>, %arg6: memref<32x32xf32, #tpu.memory_space<vmem>>, %arg7: memref<16x32xf32, #tpu.memory_space<vmem>>) attributes {dimension_semantics = [#tpu.dimension_semantics<arbitrary>], iteration_bounds = array<i64: 1>, scalar_prefetch = 0 : i64, scratch_operands = 0 : i64, tpu.core_type = #tpu.core_type<tc>, window_params = [{pipeline_mode = #tpu.pipeline_mode<synchronous>, transform_indices = @transform_0, window_bounds = array<i64: 16, 32>}, {pipeline_mode = #tpu.pipeline_mode<synchronous>, transform_indices = @transform_1, window_bounds = array<i64: 32, 96>}, {pipeline_mode = #tpu.pipeline_mode<synchronous>, transform_indices = @transform_2, window_bounds = array<i64: 32, 96>}, {pipeline_mode = #tpu.pipeline_mode<synchronous>, transform_indices = @transform_3, window_bounds = array<i64: 16, 96>}, {pipeline_mode = #tpu.pipeline_mode<synchronous>, transform_indices = @transform_4, window_bounds = array<i64: 16, 96>}, {pipeline_mode = #tpu.pipeline_mode<synchronous>, transform_indices = @transform_5, window_bounds = array<i64: 32, 32>}, {pipeline_mode = #tpu.pipeline_mode<synchronous>, transform_indices = @transform_6, window_bounds = array<i64: 16, 32>}]} {
    %c0 = arith.constant 0 : index
    %c0_0 = arith.constant 0 : index
    %0 = vector.load %arg1[%c0, %c0_0] : memref<16x32xf32, #tpu.memory_space<vmem>>, vector<16x32xf32>
    %c0_1 = arith.constant 0 : index
    %c0_2 = arith.constant 0 : index
    %1 = vector.load %arg2[%c0_1, %c0_2] : memref<32x96xf32, #tpu.memory_space<vmem>>, vector<32x96xf32>
    %cst = arith.constant dense<0.000000e+00> : vector<16x96xf32>
    %2 = tpu.matmul %0, %1, %cst {dimension_numbers = #tpu.dot_dimension_numbers<[1], [0], [0], [1], [0, 0, 1, 1], [], []>} : vector<16x32xf32>, vector<32x96xf32>, vector<16x96xf32> -> vector<16x96xf32>
    %c0_3 = arith.constant 0 : index
    %c0_4 = arith.constant 0 : index
    %3 = vector.load %arg4[%c0_3, %c0_4] : memref<16x96xf32, #tpu.memory_space<vmem>>, vector<16x96xf32>
    %4 = arith.mulf %2, %3 : vector<16x96xf32>
    %c0_5 = arith.constant 0 : index
    %c0_6 = arith.constant 0 : index
    %5 = vector.load %arg3[%c0_5, %c0_6] : memref<32x96xf32, #tpu.memory_space<vmem>>, vector<32x96xf32>
    %cst_7 = arith.constant dense<0.000000e+00> : vector<16x96xf32>
    %6 = tpu.matmul %0, %5, %cst_7 {dimension_numbers = #tpu.dot_dimension_numbers<[1], [0], [0], [1], [0, 0, 1, 1], [], []>} : vector<16x32xf32>, vector<32x96xf32>, vector<16x96xf32> -> vector<16x96xf32>
    %c0_8 = arith.constant 0 : index
    %c0_9 = arith.constant 0 : index
    %7 = vector.load %arg5[%c0_8, %c0_9] : memref<16x96xf32, #tpu.memory_space<vmem>>, vector<16x96xf32>
    %8 = arith.mulf %6, %7 : vector<16x96xf32>
    %9 = arith.addf %4, %8 : vector<16x96xf32>
    %10 = vector.extract_strided_slice %9 {offsets = [0, 0], sizes = [16, 32], strides = [1, 1]} : vector<16x96xf32> to vector<16x32xf32>
    %11 = vector.shape_cast %10 : vector<16x32xf32> to vector<2x8x32xf32>
    %12 = vector.extract_strided_slice %9 {offsets = [0, 32], sizes = [16, 32], strides = [1, 1]} : vector<16x96xf32> to vector<16x32xf32>
    %13 = vector.shape_cast %12 : vector<16x32xf32> to vector<2x8x32xf32>
    %14 = vector.extract_strided_slice %9 {offsets = [0, 64], sizes = [16, 32], strides = [1, 1]} : vector<16x96xf32> to vector<16x32xf32>
    %15 = vector.shape_cast %14 : vector<16x32xf32> to vector<2x8x32xf32>
    %16 = tpu.iota {dimensions = array<i32: 1>} : vector<2x8x8xi32>
    %17 = tpu.iota {dimensions = array<i32: 2>} : vector<2x8x8xi32>
    %18 = arith.cmpi sle, %17, %16 : vector<2x8x8xi32>
    %19 = vector.extract_strided_slice %11 {offsets = [0, 0, 0], sizes = [2, 8, 8], strides = [1, 1, 1]} : vector<2x8x32xf32> to vector<2x8x8xf32>
    %20 = vector.extract_strided_slice %13 {offsets = [0, 0, 0], sizes = [2, 8, 8], strides = [1, 1, 1]} : vector<2x8x32xf32> to vector<2x8x8xf32>
    %21 = vector.extract_strided_slice %15 {offsets = [0, 0, 0], sizes = [2, 8, 8], strides = [1, 1, 1]} : vector<2x8x32xf32> to vector<2x8x8xf32>
    "tpu.trace_start"() <{level = 10 : i32, message = "bqd,bkd->bqk"}> : () -> ()
    %cst_10 = arith.constant dense<0.000000e+00> : vector<2x8x8xf32>
    %22 = tpu.matmul %19, %20, %cst_10 {dimension_numbers = #tpu.dot_dimension_numbers<[2], [2], [1], [1], [0, 0, 0, 1, 1, 1], [0], [0]>} : vector<2x8x8xf32>, vector<2x8x8xf32>, vector<2x8x8xf32> -> vector<2x8x8xf32>
    %cst_11 = arith.constant -1.000000e+30 : f32
    "tpu.trace_stop"() : () -> ()
    %23 = vector.broadcast %cst_11 : f32 to vector<2x8x8xf32>
    %24 = arith.select %18, %22, %23 : vector<2x8x8xi1>, vector<2x8x8xf32>
    %cst_12 = arith.constant dense<0xFF800000> : vector<2x8xf32>
    %25 = vector.multi_reduction <maximumf>, %24, %cst_12 [2] : vector<2x8x8xf32> to vector<2x8xf32>
    %26 = vector.shape_cast %25 : vector<2x8xf32> to vector<2x8x1xf32>
    %27 = vector.broadcast %26 : vector<2x8x1xf32> to vector<2x8x8xf32>
    %28 = arith.subf %24, %27 : vector<2x8x8xf32>
    %29 = math.exp %28 : vector<2x8x8xf32>
    %cst_13 = arith.constant dense<0.000000e+00> : vector<2x8xf32>
    %30 = vector.multi_reduction <add>, %29, %cst_13 [2] : vector<2x8x8xf32> to vector<2x8xf32>
    %31 = vector.shape_cast %30 : vector<2x8xf32> to vector<2x8x1xf32>
    %32 = vector.broadcast %31 : vector<2x8x1xf32> to vector<2x8x8xf32>
    %33 = arith.divf %29, %32 : vector<2x8x8xf32>
    "tpu.trace_start"() <{level = 10 : i32, message = "bqk,bkd->bqd"}> : () -> ()
    %cst_14 = arith.constant dense<0.000000e+00> : vector<2x8x8xf32>
    %34 = tpu.matmul %33, %21, %cst_14 {dimension_numbers = #tpu.dot_dimension_numbers<[2], [1], [1], [2], [0, 0, 0, 1, 1, 2], [0], [0]>} : vector<2x8x8xf32>, vector<2x8x8xf32>, vector<2x8x8xf32> -> vector<2x8x8xf32>
    "tpu.trace_stop"() : () -> ()
    %35 = vector.extract_strided_slice %11 {offsets = [0, 0, 8], sizes = [2, 8, 8], strides = [1, 1, 1]} : vector<2x8x32xf32> to vector<2x8x8xf32>
    %36 = vector.extract_strided_slice %13 {offsets = [0, 0, 8], sizes = [2, 8, 8], strides = [1, 1, 1]} : vector<2x8x32xf32> to vector<2x8x8xf32>
    %37 = vector.extract_strided_slice %15 {offsets = [0, 0, 8], sizes = [2, 8, 8], strides = [1, 1, 1]} : vector<2x8x32xf32> to vector<2x8x8xf32>
    "tpu.trace_start"() <{level = 10 : i32, message = "bqd,bkd->bqk"}> : () -> ()
    %cst_15 = arith.constant dense<0.000000e+00> : vector<2x8x8xf32>
    %38 = tpu.matmul %35, %36, %cst_15 {dimension_numbers = #tpu.dot_dimension_numbers<[2], [2], [1], [1], [0, 0, 0, 1, 1, 1], [0], [0]>} : vector<2x8x8xf32>, vector<2x8x8xf32>, vector<2x8x8xf32> -> vector<2x8x8xf32>
    %cst_16 = arith.constant -1.000000e+30 : f32
    "tpu.trace_stop"() : () -> ()
    %39 = vector.broadcast %cst_16 : f32 to vector<2x8x8xf32>
    %40 = arith.select %18, %38, %39 : vector<2x8x8xi1>, vector<2x8x8xf32>
    %cst_17 = arith.constant dense<0xFF800000> : vector<2x8xf32>
    %41 = vector.multi_reduction <maximumf>, %40, %cst_17 [2] : vector<2x8x8xf32> to vector<2x8xf32>
    %42 = vector.shape_cast %41 : vector<2x8xf32> to vector<2x8x1xf32>
    %43 = vector.broadcast %42 : vector<2x8x1xf32> to vector<2x8x8xf32>
    %44 = arith.subf %40, %43 : vector<2x8x8xf32>
    %45 = math.exp %44 : vector<2x8x8xf32>
    %cst_18 = arith.constant dense<0.000000e+00> : vector<2x8xf32>
    %46 = vector.multi_reduction <add>, %45, %cst_18 [2] : vector<2x8x8xf32> to vector<2x8xf32>
    %47 = vector.shape_cast %46 : vector<2x8xf32> to vector<2x8x1xf32>
    %48 = vector.broadcast %47 : vector<2x8x1xf32> to vector<2x8x8xf32>
    %49 = arith.divf %45, %48 : vector<2x8x8xf32>
    "tpu.trace_start"() <{level = 10 : i32, message = "bqk,bkd->bqd"}> : () -> ()
    %cst_19 = arith.constant dense<0.000000e+00> : vector<2x8x8xf32>
    %50 = tpu.matmul %49, %37, %cst_19 {dimension_numbers = #tpu.dot_dimension_numbers<[2], [1], [1], [2], [0, 0, 0, 1, 1, 2], [0], [0]>} : vector<2x8x8xf32>, vector<2x8x8xf32>, vector<2x8x8xf32> -> vector<2x8x8xf32>
    "tpu.trace_stop"() : () -> ()
    %51 = vector.extract_strided_slice %11 {offsets = [0, 0, 16], sizes = [2, 8, 8], strides = [1, 1, 1]} : vector<2x8x32xf32> to vector<2x8x8xf32>
    %52 = vector.extract_strided_slice %13 {offsets = [0, 0, 16], sizes = [2, 8, 8], strides = [1, 1, 1]} : vector<2x8x32xf32> to vector<2x8x8xf32>
    %53 = vector.extract_strided_slice %15 {offsets = [0, 0, 16], sizes = [2, 8, 8], strides = [1, 1, 1]} : vector<2x8x32xf32> to vector<2x8x8xf32>
    "tpu.trace_start"() <{level = 10 : i32, message = "bqd,bkd->bqk"}> : () -> ()
    %cst_20 = arith.constant dense<0.000000e+00> : vector<2x8x8xf32>
    %54 = tpu.matmul %51, %52, %cst_20 {dimension_numbers = #tpu.dot_dimension_numbers<[2], [2], [1], [1], [0, 0, 0, 1, 1, 1], [0], [0]>} : vector<2x8x8xf32>, vector<2x8x8xf32>, vector<2x8x8xf32> -> vector<2x8x8xf32>
    %cst_21 = arith.constant -1.000000e+30 : f32
    "tpu.trace_stop"() : () -> ()
    %55 = vector.broadcast %cst_21 : f32 to vector<2x8x8xf32>
    %56 = arith.select %18, %54, %55 : vector<2x8x8xi1>, vector<2x8x8xf32>
    %cst_22 = arith.constant dense<0xFF800000> : vector<2x8xf32>
    %57 = vector.multi_reduction <maximumf>, %56, %cst_22 [2] : vector<2x8x8xf32> to vector<2x8xf32>
    %58 = vector.shape_cast %57 : vector<2x8xf32> to vector<2x8x1xf32>
    %59 = vector.broadcast %58 : vector<2x8x1xf32> to vector<2x8x8xf32>
    %60 = arith.subf %56, %59 : vector<2x8x8xf32>
    %61 = math.exp %60 : vector<2x8x8xf32>
    %cst_23 = arith.constant dense<0.000000e+00> : vector<2x8xf32>
    %62 = vector.multi_reduction <add>, %61, %cst_23 [2] : vector<2x8x8xf32> to vector<2x8xf32>
    %63 = vector.shape_cast %62 : vector<2x8xf32> to vector<2x8x1xf32>
    %64 = vector.broadcast %63 : vector<2x8x1xf32> to vector<2x8x8xf32>
    %65 = arith.divf %61, %64 : vector<2x8x8xf32>
    "tpu.trace_start"() <{level = 10 : i32, message = "bqk,bkd->bqd"}> : () -> ()
    %cst_24 = arith.constant dense<0.000000e+00> : vector<2x8x8xf32>
    %66 = tpu.matmul %65, %53, %cst_24 {dimension_numbers = #tpu.dot_dimension_numbers<[2], [1], [1], [2], [0, 0, 0, 1, 1, 2], [0], [0]>} : vector<2x8x8xf32>, vector<2x8x8xf32>, vector<2x8x8xf32> -> vector<2x8x8xf32>
    "tpu.trace_stop"() : () -> ()
    %67 = vector.extract_strided_slice %11 {offsets = [0, 0, 24], sizes = [2, 8, 8], strides = [1, 1, 1]} : vector<2x8x32xf32> to vector<2x8x8xf32>
    %68 = vector.extract_strided_slice %13 {offsets = [0, 0, 24], sizes = [2, 8, 8], strides = [1, 1, 1]} : vector<2x8x32xf32> to vector<2x8x8xf32>
    %69 = vector.extract_strided_slice %15 {offsets = [0, 0, 24], sizes = [2, 8, 8], strides = [1, 1, 1]} : vector<2x8x32xf32> to vector<2x8x8xf32>
    "tpu.trace_start"() <{level = 10 : i32, message = "bqd,bkd->bqk"}> : () -> ()
    %cst_25 = arith.constant dense<0.000000e+00> : vector<2x8x8xf32>
    %70 = tpu.matmul %67, %68, %cst_25 {dimension_numbers = #tpu.dot_dimension_numbers<[2], [2], [1], [1], [0, 0, 0, 1, 1, 1], [0], [0]>} : vector<2x8x8xf32>, vector<2x8x8xf32>, vector<2x8x8xf32> -> vector<2x8x8xf32>
    %cst_26 = arith.constant -1.000000e+30 : f32
    "tpu.trace_stop"() : () -> ()
    %71 = vector.broadcast %cst_26 : f32 to vector<2x8x8xf32>
    %72 = arith.select %18, %70, %71 : vector<2x8x8xi1>, vector<2x8x8xf32>
    %cst_27 = arith.constant dense<0xFF800000> : vector<2x8xf32>
    %73 = vector.multi_reduction <maximumf>, %72, %cst_27 [2] : vector<2x8x8xf32> to vector<2x8xf32>
    %74 = vector.shape_cast %73 : vector<2x8xf32> to vector<2x8x1xf32>
    %75 = vector.broadcast %74 : vector<2x8x1xf32> to vector<2x8x8xf32>
    %76 = arith.subf %72, %75 : vector<2x8x8xf32>
    %77 = math.exp %76 : vector<2x8x8xf32>
    %cst_28 = arith.constant dense<0.000000e+00> : vector<2x8xf32>
    %78 = vector.multi_reduction <add>, %77, %cst_28 [2] : vector<2x8x8xf32> to vector<2x8xf32>
    %79 = vector.shape_cast %78 : vector<2x8xf32> to vector<2x8x1xf32>
    %80 = vector.broadcast %79 : vector<2x8x1xf32> to vector<2x8x8xf32>
    %81 = arith.divf %77, %80 : vector<2x8x8xf32>
    "tpu.trace_start"() <{level = 10 : i32, message = "bqk,bkd->bqd"}> : () -> ()
    %cst_29 = arith.constant dense<0.000000e+00> : vector<2x8x8xf32>
    %82 = tpu.matmul %81, %69, %cst_29 {dimension_numbers = #tpu.dot_dimension_numbers<[2], [1], [1], [2], [0, 0, 0, 1, 1, 2], [0], [0]>} : vector<2x8x8xf32>, vector<2x8x8xf32>, vector<2x8x8xf32> -> vector<2x8x8xf32>
    "tpu.trace_stop"() : () -> ()
    %83 = tpu.concatenate %34, %50, %66, %82 in 2 : vector<2x8x8xf32>, vector<2x8x8xf32>, vector<2x8x8xf32>, vector<2x8x8xf32> -> vector<2x8x32xf32>
    %84 = vector.shape_cast %83 : vector<2x8x32xf32> to vector<16x32xf32>
    %c0_30 = arith.constant 0 : index
    %c0_31 = arith.constant 0 : index
    %85 = vector.load %arg6[%c0_30, %c0_31] : memref<32x32xf32, #tpu.memory_space<vmem>>, vector<32x32xf32>
    %cst_32 = arith.constant dense<0.000000e+00> : vector<16x32xf32>
    %86 = tpu.matmul %84, %85, %cst_32 {dimension_numbers = #tpu.dot_dimension_numbers<[1], [0], [0], [1], [0, 0, 1, 1], [], []>} : vector<16x32xf32>, vector<32x32xf32>, vector<16x32xf32> -> vector<16x32xf32>
    %c0_33 = arith.constant 0 : index
    %c0_34 = arith.constant 0 : index
    %87 = vector.load %arg7[%c0_33, %c0_34] : memref<16x32xf32, #tpu.memory_space<vmem>>, vector<16x32xf32>
    tpu.vector_store %arg7[%c0_33, %c0_34], %86 {strides = array<i32>} : memref<16x32xf32, #tpu.memory_space<vmem>>, vector<16x32xf32>,
    return
  }
  func.func @transform_0(%arg0: i32) -> (i32, i32) {
    %c0_i32 = arith.constant 0 : i32
    %c0_i32_0 = arith.constant 0 : i32
    %c0_i32_1 = arith.constant 0 : i32
    return %c0_i32, %c0_i32_0 : i32, i32
  }
  func.func @transform_1(%arg0: i32) -> (i32, i32) {
    %c0_i32 = arith.constant 0 : i32
    %c0_i32_0 = arith.constant 0 : i32
    %c0_i32_1 = arith.constant 0 : i32
    return %c0_i32, %c0_i32_0 : i32, i32
  }
  func.func @transform_2(%arg0: i32) -> (i32, i32) {
    %c0_i32 = arith.constant 0 : i32
    %c0_i32_0 = arith.constant 0 : i32
    %c0_i32_1 = arith.constant 0 : i32
    return %c0_i32, %c0_i32_0 : i32, i32
  }
  func.func @transform_3(%arg0: i32) -> (i32, i32) {
    %c0_i32 = arith.constant 0 : i32
    %c0_i32_0 = arith.constant 0 : i32
    %c0_i32_1 = arith.constant 0 : i32
    return %c0_i32, %c0_i32_0 : i32, i32
  }
  func.func @transform_4(%arg0: i32) -> (i32, i32) {
    %c0_i32 = arith.constant 0 : i32
    %c0_i32_0 = arith.constant 0 : i32
    %c0_i32_1 = arith.constant 0 : i32
    return %c0_i32, %c0_i32_0 : i32, i32
  }
  func.func @transform_5(%arg0: i32) -> (i32, i32) {
    %c0_i32 = arith.constant 0 : i32
    %c0_i32_0 = arith.constant 0 : i32
    %c0_i32_1 = arith.constant 0 : i32
    return %c0_i32, %c0_i32_0 : i32, i32
  }
  func.func @transform_6(%arg0: i32) -> (i32, i32) {
    %c0_i32 = arith.constant 0 : i32
    %c0_i32_0 = arith.constant 0 : i32
    %c0_i32_1 = arith.constant 0 : i32
    return %c0_i32, %c0_i32_0 : i32, i32
  }
}

</mosaic_0001>

<bundles_post_ra>
// kernel: multihead_attention.1
= control target key start
LH: loop header
LB: loop body
LE: loop exit
PB: predicated region body
PF: predicated region fallthrough
CT: control target
= control target key end

     0   :  { %11 = vsyncpa [#allocation3], 0  ;;  %s2414_s0 = inlined_call_operand.hbm [shape: f32[16,32], index: 0, kind: input, shape index: {}]   ;;  %s2415_s1 = inlined_call_operand.hbm [shape: f32[32,96], index: 1, kind: input, shape index: {}]   ;;  %s2416_s2 = inlined_call_operand.hbm [shape: f32[32,96], index: 2, kind: input, shape index: {}]   ;;  %s2417_s3 = inlined_call_operand.hbm [shape: f32[16,96], index: 3, kind: input, shape index: {}]   ;;  %s2418_s4 = inlined_call_operand.hbm [shape: f32[16,96], index: 4, kind: input, shape index: {}]   ;;  %s2419_s5 = inlined_call_operand.hbm [shape: f32[32,32], index: 5, kind: input, shape index: {}]   ;;  %s2420_s6 = inlined_call_operand.hbm [shape: f32[16,32], index: 6, kind: output, shape index: {}]  }
   0x1   :  { %12 = vsyncpa [#allocation6], 0 }
   0x2   :  { %13 = vsyncpa [#allocation9], 0 }
   0x3   :  { %14 = vsyncpa [#allocation12], 0 }
   0x4   :  { %15 = vsyncpa [#allocation4], 0  ;;  %s2153_s21 = smov [#allocation5]   ;;  %s2154_s23 = smov [#allocation8]  }
   0x5   :  { %s33_s22 = sshll.u32 %s2153_s21, 4  ;;  %s57_s24 = sshll.u32 %s2154_s23, 4  ;;  %s34_s22 = int_to_ptr.vmem [resolvable:$true] %s33_s22  ;;  %s58_s24 = int_to_ptr.vmem [resolvable:$true] %s57_s24 }
   0x6   :  { %s2011_s25 = scalar_lea.vmem %s34_s22, 512  ;;  %p2016_p1 = scmp.lt.s32.totalorder %s34_s22, %s34_s22 }
   0x7   :  { %p2012_p0 = scmp.ne.s32.totalorder %s34_s22, %s2011_s25  ;;  %p2017_p2 = scmp.lt.s32.totalorder %s2011_s25, %s2011_s25 }
   0x9   :  { %p2018_p3 = por %p2017_p2, %p2016_p1 }
   0xb   :  { %p2019_p4 = pnand %p2018_p3, %p2012_p0 }
   0xd   :  { %2022 = shalt.err (!%p2019_p4)
}
   0xe   :  { %s2155_s26 = smov 128   ;;  %s2156_s27 = smov 8  }
   0xf   :  { %39 = dma.hbm_to_vmem [thread:$0]  %s2415_s1, 512, %s34_s22, [#allocation6], %s2155_s26, %s2155_s26, %s2156_s27  }
  0x10   :  { %s2031_s30 = scalar_lea.vmem %s58_s24, 256  ;;  %p2036_p6 = scmp.lt.s32.totalorder %s58_s24, %s58_s24 }
  0x11   :  { %p2032_p5 = scmp.ne.s32.totalorder %s58_s24, %s2031_s30  ;;  %p2037_p7 = scmp.lt.s32.totalorder %s2031_s30, %s2031_s30 }
  0x13   :  { %p2038_p8 = por %p2037_p7, %p2036_p6 }
  0x15   :  { %p2039_p9 = pnand %p2038_p8, %p2032_p5 }
  0x17   :  { %2042 = shalt.err (!%p2039_p9)
}
  0x18   :  { %63 = dma.hbm_to_vmem [thread:$0]  %s2417_s3, 256, %s58_s24, [#allocation9], %s2155_s26, %s2155_s26, %s2156_s27  }
  0x19   :  { %s2157_s9 = smov [#allocation2]   ;;  %s2158_s11 = smov [#allocation7]  }
  0x1a   :  { %s21_s10 = sshll.u32 %s2157_s9, 4  ;;  %s45_s12 = sshll.u32 %s2158_s11, 4  ;;  %s22_s10 = int_to_ptr.vmem [resolvable:$true] %s21_s10  ;;  %s46_s12 = int_to_ptr.vmem [resolvable:$true] %s45_s12 }
  0x1b   :  { %s2051_s1 = scalar_lea.vmem %s22_s10, 256  ;;  %p2056_p11 = scmp.lt.s32.totalorder %s22_s10, %s22_s10 }
  0x1c   :  { %p2052_p10 = scmp.ne.s32.totalorder %s22_s10, %s2051_s1  ;;  %p2057_p12 = scmp.lt.s32.totalorder %s2051_s1, %s2051_s1 }
  0x1e   :  { %p2058_p13 = por %p2057_p12, %p2056_p11 }
  0x20   :  { %p2059_p0 = pnand %p2058_p13, %p2052_p10 }
  0x22   :  { %2062 = shalt.err (!%p2059_p0)
}
  0x23   :  { %27 = dma.hbm_to_vmem [thread:$0]  %s2414_s0, 256, %s22_s10, [#allocation3], %s2155_s26, %s2155_s26, %s2156_s27  }
  0x24   :  { %s2071_s3 = scalar_lea.vmem %s46_s12, 512  ;;  %p2076_p2 = scmp.lt.s32.totalorder %s46_s12, %s46_s12 }
  0x25   :  { %p2072_p1 = scmp.ne.s32.totalorder %s46_s12, %s2071_s3  ;;  %p2077_p3 = scmp.lt.s32.totalorder %s2071_s3, %s2071_s3 }
  0x27   :  { %p2078_p4 = por %p2077_p3, %p2076_p2 }
  0x29   :  { %p2079_p5 = pnand %p2078_p4, %p2072_p1 }
  0x2b   :  { %2082 = shalt.err (!%p2079_p5)
}
  0x2c   :  { %51 = dma.hbm_to_vmem [thread:$0]  %s2416_s2, 512, %s46_s12, [#allocation6], %s2155_s26, %s2155_s26, %s2156_s27  }
  0x2d   :  { %s2159_s17 = smov [#allocation10]   ;;  %s2160_s19 = smov [#allocation11]  }
  0x2e   :  { %s69_s18 = sshll.u32 %s2159_s17, 4  ;;  %s81_s20 = sshll.u32 %s2160_s19, 4  ;;  %s70_s18 = int_to_ptr.vmem [resolvable:$true] %s69_s18  ;;  %s82_s20 = int_to_ptr.vmem [resolvable:$true] %s81_s20 }
  0x2f   :  { %s2091_s0 = scalar_lea.vmem %s70_s18, 256  ;;  %p2096_p7 = scmp.lt.s32.totalorder %s70_s18, %s70_s18 }
  0x30   :  { %p2092_p6 = scmp.ne.s32.totalorder %s70_s18, %s2091_s0  ;;  %p2097_p8 = scmp.lt.s32.totalorder %s2091_s0, %s2091_s0 }
  0x32   :  { %p2098_p9 = por %p2097_p8, %p2096_p7 }
  0x34   :  { %p2099_p10 = pnand %p2098_p9, %p2092_p6 }
  0x36   :  { %2102 = shalt.err (!%p2099_p10)
}
  0x37   :  { %75 = dma.hbm_to_vmem [thread:$0]  %s2418_s4, 256, %s70_s18, [#allocation9], %s2155_s26, %s2155_s26, %s2156_s27  }
  0x38   :  { %s2111_s2 = scalar_lea.vmem %s82_s20, 512  ;;  %p2116_p12 = scmp.lt.s32.totalorder %s82_s20, %s82_s20 }
  0x39   :  { %p2112_p11 = scmp.ne.s32.totalorder %s82_s20, %s2111_s2  ;;  %p2117_p13 = scmp.lt.s32.totalorder %s2111_s2, %s2111_s2 }
  0x3b   :  { %p2118_p0 = por %p2117_p13, %p2116_p12 }
  0x3d   :  { %p2119_p1 = pnand %p2118_p0, %p2112_p11 }
  0x3f   :  { %2122 = shalt.err (!%p2119_p1)
}
  0x40   :  { %87 = dma.hbm_to_vmem [thread:$0]  %s2419_s5, 512, %s82_s20, [#allocation12], %s2155_s26, %s2155_s26, %s2156_s27  }
  0x41   :  { %2143 = dma.done.wait [#allocation3], 256  }
  0x42   :  { %2144 = vsyncadd [#allocation3], 4294967040 }
  0x43   :  { %2145 = dma.done.wait [#allocation6], 1024  }
  0x44   :  { %2146 = vsyncadd [#allocation6], 4294966272 }
  0x45   :  { %2147 = dma.done.wait [#allocation9], 512  }
  0x46   :  { %2148 = vsyncadd [#allocation9], 4294966784 }
  0x47   :  { %2149 = dma.done.wait [#allocation12], 512  }
  0x48   :  { %2150 = vsyncadd [#allocation12], 4294966784  ;;  %v111_v0 = vld [vmem:[#allocation5 + $0x18] sm:$0xff]  ;;  %v110_v2 = vld [vmem:[#allocation5 + $0x10] sm:$0xff]  ;;  %vm112_vm0 = vcmask 261120   ;;  %v2161_v10 = vmov 0.0   ;;  %v283_v27 = vlaneseq }
  0x49   :  { %v201_v1 = vld [vmem:[#allocation7 + $0x18] sm:$0xff]  ;;  %1834 = vmatprep.subr.mxu0 %v111_v0  ;;  %v200_v3 = vld [vmem:[#allocation7 + $0x10] sm:$0xff]  ;;  %v109_v4 = vld [vmem:[#allocation5 + $0x8] sm:$0xff]  ;;  %vm2162_vm1 = vmmov 0   ;;  %s2163_s4 = smov 96   ;;  %vm291_vm2 = vcmask 64512  }
  0x4a   :  { %1845 = vmatprep.subr.mxu1 %v201_v1  ;;  %1835 = vmatpush3.msra.mxu0 %v111_v0  ;;  %v199_v5 = vld [vmem:[#allocation7 + $0x8] sm:$0xff]  ;;  %v108_v6 = vld [vmem:[#allocation5] sm:$0xff]  ;;  %v106_v8 = vld [vmem:[#allocation2] sm:$0xff]  ;;  %v284_v28 = vshrl.u32 %v283_v27, 7  ;;  %v286_v29 = vand.u32 127, %v283_v27  ;;  %s2164_s5 = smov 64  }
  0x4b   :  { %1846 = vmatpush3.msra.mxu1 %v201_v1  ;;  %1836 = vmatprep.subr.mxu0 %v110_v2  ;;  %v198_v7 = vld [vmem:[#allocation7] sm:$0xff]  ;;  %v107_v9 = vld [vmem:[#allocation2 + $0x8] sm:$0xff]  ;;  %v277_v14 = vld [vmem:[#allocation10] sm:$0xff]  ;;  %s2165_s25 = smov 88   ;;  %s2166_s28 = smov 120   ;;  %vm1644_vm4 = vcmask 195584  }
  0x4c   :  { %1847 = vmatprep.subr.mxu1 %v200_v3  ;;  %1837 = vmatpush3.msra.mxu0 %v110_v2  ;;  %v194_v13 = vld [vmem:[#allocation8] sm:$0xff]  ;;  %v195_v15 = vld [vmem:[#allocation8 + $0x8] sm:$0xff]  ;;  %v278_v16 = vld [vmem:[#allocation10 + $0x8] sm:$0xff]  ;;  %vm2276_vm3 = vcmp.le.s32.totalorder %v286_v29, %v284_v28  ;;  %s2167_s29 = smov 56   ;;  %s2168_s30 = smov 80   ;;  %vm1641_vm5 = vcmask 130048  }
  0x4d   :  { %1848 = vmatpush3.msra.mxu1 %v200_v3  ;;  %1838 = vmatprep.subr.mxu0 %v109_v4  ;;  %s2169_s7 = smov 112   ;;  %s2170_s8 = smov 48  }
  0x4e   :  { %1849 = vmatprep.subr.mxu1 %v199_v5  ;;  %1839 = vmatpush3.msra.mxu0 %v109_v4  ;;  %s2171_s9 = smov 72   ;;  %s2172_s10 = smov 104  }
  0x4f   :  { %1850 = vmatpush3.msra.mxu1 %v199_v5  ;;  %1840 = vmatprep.subr.mxu0 %v108_v6  ;;  %s2173_s11 = smov 40   ;;  %s2174_s12 = smov 16  }
  0x50   :  { %1851 = vmatprep.subr.mxu1 %v198_v7  ;;  %1841 = vmatpush3.msra.mxu0 %v108_v6  ;;  %s2175_s1 = smov 24   ;;  %s2176_s13 = smov [#allocation13]  }
  0x51   :  { %1842 = vmatprep.mubr.msk.f32.mxu0 %vm112_vm0, %v106_v8  ;;  %1852 = vmatpush3.msra.mxu1 %v198_v7  ;;  %s1739_s14 = sshll.u32 %s2176_s13, 4  ;;  %s1740_s14 = int_to_ptr.vmem [resolvable:$true] %s1739_s14 }
  0x52   :  { %1853 = vmatprep.mubr.msk.f32.mxu1 %vm112_vm0, %v106_v8  ;;  %1843 = vmatmul.mubr.msk.f32.vlgmr.msra.gmra.mxu0 %vm112_vm0, %v107_v9  ;;  %s2123_s3 = scalar_lea.vmem %s1740_s14, 256  ;;  %p2128_p3 = scmp.lt.s32.totalorder %s1740_s14, %s1740_s14 }
  0x53   :  { %1854 = vmatmul.mubr.msk.f32.vlgmr.msra.gmra.mxu1 %vm112_vm0, %v107_v9  ;;  %1856 = vmatprep.subr.mxu1 %v2161_v10  ;;  %p2124_p2 = scmp.ne.s32.totalorder %s1740_s14, %s2123_s3  ;;  %p2129_p4 = scmp.lt.s32.totalorder %s2123_s3, %s2123_s3 }
  0x54   :  { %1866 = vmatprep.subr.mxu0 %v2161_v10  ;;  %1858 = vmatprep.mubr.msk.f32.mxu1 %vm2162_vm1, %v2161_v10 }
  0x55   :  { %1868 = vmatprep.mubr.msk.f32.mxu0 %vm2162_vm1, %v2161_v10  ;;  %p2130_p5 = por %p2129_p4, %p2128_p3 }
  0x57   :  { %p2131_p6 = pnand %p2130_p5, %p2124_p2 }
 0x112   :  { %v1844_v11 = vpop.f32.mrf.mxu0 }
 0x113   :  { %v1855_v12 = vpop.f32.mrf.mxu1  ;;  %v197_v21 = vmul.f32 %v1844_v11, %v195_v15 }
 0x114   :  { %v185_v17 = vpop.f32.mrf.mxu0  ;;  %v280_v22 = vmul.f32 %v1855_v12, %v278_v16 }
 0x115   :  { %v268_v18 = vpop.f32.mrf.mxu1  ;;  %v196_v19 = vmul.f32 %v194_v13, %v185_v17 }
 0x116   :  { %v279_v20 = vmul.f32 %v277_v14, %v268_v18  ;;  %v2261_v24 = vadd.f32 %v280_v22, %v197_v21 }
 0x118   :  { %v2258_v23 = vadd.f32 %v279_v20, %v196_v19 }
 0x11a   :  { %289 = vrot.lane.b32.xlu0 %v2258_v23, %s2163_s4 }
 0x11e   :  { %367 = vrot.lane.b32.xlu0 %v2261_v24, %s2163_s4 }
 0x18c   :  { %v290_v25 = vpop.permute.xlu0 %289 }
 0x18d   :  { %1857 = vmatpush3.xpose.msk.msra.mxu1 %vm291_vm2, %v290_v25 }
 0x18e   :  { %1861 = vmatprep.subr.mxu1 %v2161_v10 }
 0x190   :  { %1859 = vmatmul.mubr.msk.f32.vlgmr.msra.gmra.mxu1 %vm291_vm2, %v2258_v23  ;;  %v368_v26 = vpop.permute.xlu0 %367 }
 0x191   :  { %1862 = vmatpush3.xpose.msk.msra.mxu1 %vm291_vm2, %v368_v26  ;;  %1863 = vmatprep.mubr.msk.f32.mxu1 %vm2162_vm1, %v2161_v10 }
 0x192   :  { %1871 = vmatprep.subr.mxu1 %v2161_v10 }
 0x194   :  { %1864 = vmatmul.mubr.msk.f32.vlgmr.msra.gmra.mxu1 %vm291_vm2, %v2261_v24 }
 0x195   :  { %1873 = vmatprep.mubr.msk.f32.mxu1 %vm2162_vm1, %v2161_v10 }
 0x250   :  { %v362_v31 = vpop.f32.mrf.mxu1 }
 0x251   :  { %v443_v32 = vsel %vm2276_vm3, %v362_v31, -1e+30 }
 0x252   :  { %v1860_v33 = vpop.f32.mrf.mxu1  ;;  %v445_v34 = vsel %vm291_vm2, %v443_v32, -inf }
 0x253   :  { %446 = vmax.xlane.f32.xlu1 %v445_v34 }
 0x254   :  { %v439_v35 = vpop.f32.mrf.mxu1 }
 0x255   :  { %v444_v36 = vsel %vm2276_vm3, %v439_v35, -1e+30 }
 0x256   :  { %v1865_v37 = vpop.f32.mrf.mxu1  ;;  %v448_v38 = vsel %vm291_vm2, %v444_v36, -inf }
 0x257   :  { %449 = vmax.xlane.f32.xlu1 %v448_v38 }
 0x268   :  { %467 = vrot.lane.b32.xlu1 %v2258_v23, %s2164_s5 }
 0x26c   :  { %543 = vrot.lane.b32.xlu1 %v2261_v24, %s2164_s5 }
 0x270   :  { %621 = vrot.lane.b32.xlu1 %v2258_v23, %s2165_s25 }
 0x274   :  { %699 = vrot.lane.b32.xlu1 %v2261_v24, %s2165_s25 }
 0x2dc   :  { %v447_v39 = vpop.xlane.xlu1 %446 }
 0x2dd   :  { %v451_v40 = vsub.f32 %v443_v32, %v447_v39 }
 0x2df   :  { %v453_v41 = vmul.f32 1.442695, %v451_v40 }
 0x2e0   :  { %v450_v42 = vpop.xlane.xlu1 %449 }
 0x2e1   :  { %1971 = vpow2.f32 %v453_v41  ;;  %v452_v43 = vsub.f32 %v444_v36, %v450_v42 }
 0x2e3   :  { %v455_v44 = vmul.f32 1.442695, %v452_v43 }
 0x2e4   :  { %v468_v45 = vpop.permute.xlu1 %467 }
 0x2e5   :  { %1973 = vpow2.f32 %v455_v44  ;;  %1867 = vmatpush3.msra.mxu0 %v468_v45 }
 0x2e6   :  { %1876 = vmatprep.subr.mxu0 %v2161_v10 }
 0x2e8   :  { %v544_v46 = vpop.permute.xlu1 %543 }
 0x2e9   :  { %1872 = vmatpush3.msra.mxu1 %v544_v46 }
 0x2ea   :  { %1881 = vmatprep.subr.mxu1 %v2161_v10 }
 0x2ec   :  { %v622_v51 = vpop.permute.xlu1 %621 }
 0x2ee   :  { %v1972_v47 = vpop.eup %1971 }
 0x2ef   :  { %v457_v48 = vsel %vm291_vm2, %v1972_v47, 0.0 }
 0x2f0   :  { %458 = vadd.xlane.f32.xlu0 %v457_v48  ;;  %v700_v52 = vpop.permute.xlu1 %699 }
 0x2f2   :  { %v1974_v49 = vpop.eup %1973 }
 0x2f3   :  { %v460_v50 = vsel %vm291_vm2, %v1974_v49, 0.0 }
 0x2f4   :  { %461 = vadd.xlane.f32.xlu1 %v460_v50 }
 0x305   :  { %697 = vrot.lane.b32.xlu1 %v2261_v24, %s2166_s28 }
 0x306   :  { %619 = vrot.lane.b32.xlu0 %v2258_v23, %s2166_s28 }
 0x379   :  { %v459_v53 = vpop.xlane.xlu0 %458 }
 0x37a   :  { %1975 = vrcp.f32 %v459_v53 }
 0x37d   :  { %v462_v54 = vpop.xlane.xlu1 %461  ;;  %v620_v59 = vpop.permute.xlu0 %619 }
 0x37e   :  { %1977 = vrcp.f32 %v462_v54 }
 0x381   :  { %v698_v60 = vpop.permute.xlu1 %697 }
 0x387   :  { %v1976_v55 = vpop.eup %1975 }
 0x388   :  { %v464_v56 = vmul.f32 %v1976_v55, %v1972_v47 }
 0x38a   :  { %1869 = vmatmul.mubr.msk.f32.vlgmr.msra.gmra.mxu0 %vm291_vm2, %v464_v56 }
 0x38b   :  { %v1978_v57 = vpop.eup %1977  ;;  %1877 = vmatpush3.xpose.msk.msra.mxu0 %vm291_vm2, %v622_v51  ;;  %1878 = vmatprep.mubr.msk.f32.mxu0 %vm2162_vm1, %v2161_v10 }
 0x38c   :  { %v466_v58 = vmul.f32 %v1978_v57, %v1974_v49  ;;  %1886 = vmatprep.subr.mxu0 %v2161_v10 }
 0x38e   :  { %1874 = vmatmul.mubr.msk.f32.vlgmr.msra.gmra.mxu1 %vm291_vm2, %v466_v58  ;;  %1879 = vmatmul.mubr.msk.f32.vlgmr.msra.gmra.mxu0 %vm291_vm2, %v620_v59 }
 0x38f   :  { %1882 = vmatpush3.xpose.msk.msra.mxu1 %vm291_vm2, %v700_v52  ;;  %1883 = vmatprep.mubr.msk.f32.mxu1 %vm2162_vm1, %v2161_v10 }
 0x390   :  { %1891 = vmatprep.subr.mxu1 %v2161_v10  ;;  %1888 = vmatprep.mubr.msk.f32.mxu0 %vm2162_vm1, %v2161_v10 }
 0x392   :  { %1884 = vmatmul.mubr.msk.f32.vlgmr.msra.gmra.mxu1 %vm291_vm2, %v698_v60 }
 0x393   :  { %1893 = vmatprep.mubr.msk.f32.mxu1 %vm2162_vm1, %v2161_v10 }
 0x44a   :  { %v2312_v61 = vpop.f32.mrf.mxu0 }
 0x44c   :  { %v1870_v62 = vpop.f32.mrf.mxu0 }
 0x44e   :  { %v2314_v63 = vpop.f32.mrf.mxu1  ;;  %v693_v0 = vpop.f32.mrf.mxu0 }
 0x44f   :  { %v775_v1 = vsel %vm2276_vm3, %v693_v0, -1e+30 }
 0x450   :  { %v1875_v2 = vpop.f32.mrf.mxu1  ;;  %v1880_v3 = vpop.f32.mrf.mxu0  ;;  %v777_v4 = vsel %vm291_vm2, %v775_v1, -inf }
 0x451   :  { %778 = vmax.xlane.f32.xlu1 %v777_v4 }
 0x452   :  { %v771_v5 = vpop.f32.mrf.mxu1 }
 0x453   :  { %v776_v6 = vsel %vm2276_vm3, %v771_v5, -1e+30 }
 0x454   :  { %v1885_v7 = vpop.f32.mrf.mxu1  ;;  %v780_v8 = vsel %vm291_vm2, %v776_v6, -inf }
 0x455   :  { %781 = vmax.xlane.f32.xlu0 %v780_v8 }
 0x462   :  { %799 = vrot.lane.b32.xlu1 %v2258_v23, %s2167_s29 }
 0x466   :  { %953 = vrot.lane.b32.xlu1 %v2258_v23, %s2168_s30 }
 0x46a   :  { %1031 = vrot.lane.b32.xlu1 %v2261_v24, %s2168_s30 }
 0x46b   :  { %875 = vrot.lane.b32.xlu0 %v2261_v24, %s2167_s29 }
 0x46f   :  { %951 = vrot.lane.b32.xlu0 %v2258_v23, %s2169_s7 }
 0x4da   :  { %v779_v9 = vpop.xlane.xlu1 %778 }
 0x4db   :  { %v783_v11 = vsub.f32 %v775_v1, %v779_v9 }
 0x4dd   :  { %v785_v12 = vmul.f32 1.442695, %v783_v11 }
 0x4de   :  { %v800_v13 = vpop.permute.xlu1 %799  ;;  %v782_v14 = vpop.xlane.xlu0 %781 }
 0x4df   :  { %1979 = vpow2.f32 %v785_v12  ;;  %v784_v15 = vsub.f32 %v776_v6, %v782_v14  ;;  %1887 = vmatpush3.msra.mxu0 %v800_v13 }
 0x4e0   :  { %1896 = vmatprep.subr.mxu0 %v2161_v10 }
 0x4e1   :  { %v787_v16 = vmul.f32 1.442695, %v784_v15 }
 0x4e2   :  { %v876_v17 = vpop.permute.xlu0 %875  ;;  %v954_v22 = vpop.permute.xlu1 %953 }
 0x4e3   :  { %1981 = vpow2.f32 %v787_v16  ;;  %1892 = vmatpush3.msra.mxu1 %v876_v17 }
 0x4e4   :  { %1901 = vmatprep.subr.mxu1 %v2161_v10 }
 0x4e6   :  { %v1032_v25 = vpop.permute.xlu1 %1031  ;;  %v952_v33 = vpop.permute.xlu0 %951 }
 0x4ec   :  { %v1980_v18 = vpop.eup %1979 }
 0x4ed   :  { %v789_v19 = vsel %vm291_vm2, %v1980_v18, 0.0 }
 0x4ee   :  { %790 = vadd.xlane.f32.xlu1 %v789_v19 }
 0x4f0   :  { %v1982_v20 = vpop.eup %1981 }
 0x4f1   :  { %v792_v21 = vsel %vm291_vm2, %v1982_v20, 0.0 }
 0x4f2   :  { %793 = vadd.xlane.f32.xlu1 %v792_v21 }
 0x503   :  { %1029 = vrot.lane.b32.xlu1 %v2261_v24, %s2169_s7 }
 0x577   :  { %v791_v26 = vpop.xlane.xlu1 %790 }
 0x578   :  { %1983 = vrcp.f32 %v791_v26 }
 0x57b   :  { %v794_v27 = vpop.xlane.xlu1 %793 }
 0x57c   :  { %1985 = vrcp.f32 %v794_v27 }
 0x57f   :  { %v1030_v34 = vpop.permute.xlu1 %1029 }
 0x585   :  { %v1984_v28 = vpop.eup %1983 }
 0x586   :  { %v796_v29 = vmul.f32 %v1984_v28, %v1980_v18 }
 0x588   :  { %1889 = vmatmul.mubr.msk.f32.vlgmr.msra.gmra.mxu0 %vm291_vm2, %v796_v29 }
 0x589   :  { %v1986_v31 = vpop.eup %1985  ;;  %1897 = vmatpush3.xpose.msk.msra.mxu0 %vm291_vm2, %v954_v22  ;;  %1898 = vmatprep.mubr.msk.f32.mxu0 %vm2162_vm1, %v2161_v10 }
 0x58a   :  { %v798_v32 = vmul.f32 %v1986_v31, %v1982_v20  ;;  %1906 = vmatprep.subr.mxu0 %v2161_v10 }
 0x58c   :  { %1894 = vmatmul.mubr.msk.f32.vlgmr.msra.gmra.mxu1 %vm291_vm2, %v798_v32  ;;  %1899 = vmatmul.mubr.msk.f32.vlgmr.msra.gmra.mxu0 %vm291_vm2, %v952_v33 }
 0x58d   :  { %1902 = vmatpush3.xpose.msk.msra.mxu1 %vm291_vm2, %v1032_v25  ;;  %1903 = vmatprep.mubr.msk.f32.mxu1 %vm2162_vm1, %v2161_v10 }
 0x58e   :  { %1911 = vmatprep.subr.mxu1 %v2161_v10  ;;  %1908 = vmatprep.mubr.msk.f32.mxu0 %vm2162_vm1, %v2161_v10 }
 0x590   :  { %1904 = vmatmul.mubr.msk.f32.vlgmr.msra.gmra.mxu1 %vm291_vm2, %v1030_v34 }
 0x591   :  { %1913 = vmatprep.mubr.msk.f32.mxu1 %vm2162_vm1, %v2161_v10 }
 0x648   :  { %v2348_v35 = vpop.f32.mrf.mxu0 }
 0x64a   :  { %v1890_v36 = vpop.f32.mrf.mxu0 }
 0x64c   :  { %v2350_v37 = vpop.f32.mrf.mxu1  ;;  %v1025_v38 = vpop.f32.mrf.mxu0 }
 0x64d   :  { %v1107_v39 = vsel %vm2276_vm3, %v1025_v38, -1e+30  ;;  %v1650_v38 = vld [vmem:[#allocation11 + $0x18] sm:$0xff] }
 0x64e   :  { %v1895_v40 = vpop.f32.mrf.mxu1  ;;  %v1900_v41 = vpop.f32.mrf.mxu0  ;;  %v1109_v42 = vsel %vm291_vm2, %v1107_v39, -inf }
 0x64f   :  { %1110 = vmax.xlane.f32.xlu0 %v1109_v42  ;;  %v1647_v40 = vld [vmem:[#allocation11] sm:$0xff] }
 0x650   :  { %v1103_v43 = vpop.f32.mrf.mxu1 }
 0x651   :  { %v1108_v44 = vsel %vm2276_vm3, %v1103_v43, -1e+30 }
 0x652   :  { %v1905_v45 = vpop.f32.mrf.mxu1  ;;  %v1112_v46 = vsel %vm291_vm2, %v1108_v44, -inf }
 0x653   :  { %1113 = vmax.xlane.f32.xlu1 %v1112_v46 }
 0x664   :  { %1131 = vrot.lane.b32.xlu1 %v2258_v23, %s2170_s8 }
 0x665   :  { %1207 = vrot.lane.b32.xlu0 %v2261_v24, %s2170_s8 }
 0x668   :  { %1285 = vrot.lane.b32.xlu1 %v2258_v23, %s2171_s9 }
 0x66c   :  { %1363 = vrot.lane.b32.xlu1 %v2261_v24, %s2171_s9 }
 0x670   :  { %1361 = vrot.lane.b32.xlu1 %v2261_v24, %s2172_s10 }
 0x6d8   :  { %v1111_v47 = vpop.xlane.xlu0 %1110 }
 0x6d9   :  { %v1115_v48 = vsub.f32 %v1107_v39, %v1111_v47  ;;  %v1649_v39 = vld [vmem:[#allocation11 + $0x10] sm:$0xff] }
 0x6db   :  { %v1117_v49 = vmul.f32 1.442695, %v1115_v48 }
 0x6dc   :  { %v1114_v50 = vpop.xlane.xlu1 %1113  ;;  %v1208_v51 = vpop.permute.xlu0 %1207 }
 0x6dd   :  { %1987 = vpow2.f32 %v1117_v49  ;;  %v1116_v52 = vsub.f32 %v1108_v44, %v1114_v50  ;;  %1912 = vmatpush3.msra.mxu1 %v1208_v51 }
 0x6de   :  { %1921 = vmatprep.subr.mxu1 %v2161_v10 }
 0x6df   :  { %v1119_v53 = vmul.f32 1.442695, %v1116_v52 }
 0x6e0   :  { %v1132_v54 = vpop.permute.xlu1 %1131 }
 0x6e1   :  { %1989 = vpow2.f32 %v1119_v53  ;;  %1907 = vmatpush3.msra.mxu0 %v1132_v54 }
 0x6e2   :  { %1916 = vmatprep.subr.mxu0 %v2161_v10 }
 0x6e4   :  { %v1286_v62 = vpop.permute.xlu1 %1285 }
 0x6e8   :  { %v1364_v3 = vpop.permute.xlu1 %1363 }
 0x6ea   :  { %v1988_v55 = vpop.eup %1987 }
 0x6eb   :  { %v1121_v56 = vsel %vm291_vm2, %v1988_v55, 0.0 }
 0x6ec   :  { %1122 = vadd.xlane.f32.xlu0 %v1121_v56  ;;  %v1362_v6 = vpop.permute.xlu1 %1361 }
 0x6ee   :  { %v1990_v57 = vpop.eup %1989 }
 0x6ef   :  { %v1124_v58 = vsel %vm291_vm2, %v1990_v57, 0.0 }
 0x6f0   :  { %1125 = vadd.xlane.f32.xlu0 %v1124_v58 }
 0x706   :  { %1283 = vrot.lane.b32.xlu0 %v2258_v23, %s2172_s10 }
 0x775   :  { %v1123_v59 = vpop.xlane.xlu0 %1122 }
 0x776   :  { %1991 = vrcp.f32 %v1123_v59 }
 0x779   :  { %v1126_v60 = vpop.xlane.xlu0 %1125 }
 0x77a   :  { %1993 = vrcp.f32 %v1126_v60 }
 0x77d   :  { %v1284_v5 = vpop.permute.xlu0 %1283 }
 0x783   :  { %v1992_v0 = vpop.eup %1991 }
 0x784   :  { %v1128_v1 = vmul.f32 %v1992_v0, %v1988_v55 }
 0x786   :  { %1909 = vmatmul.mubr.msk.f32.vlgmr.msra.gmra.mxu0 %vm291_vm2, %v1128_v1 }
 0x787   :  { %v1994_v2 = vpop.eup %1993  ;;  %1917 = vmatpush3.xpose.msk.msra.mxu0 %vm291_vm2, %v1286_v62  ;;  %1918 = vmatprep.mubr.msk.f32.mxu0 %vm2162_vm1, %v2161_v10 }
 0x788   :  { %v1130_v4 = vmul.f32 %v1994_v2, %v1990_v57  ;;  %1926 = vmatprep.subr.mxu0 %v2161_v10 }
 0x78a   :  { %1914 = vmatmul.mubr.msk.f32.vlgmr.msra.gmra.mxu1 %vm291_vm2, %v1130_v4  ;;  %1919 = vmatmul.mubr.msk.f32.vlgmr.msra.gmra.mxu0 %vm291_vm2, %v1284_v5 }
 0x78b   :  { %1922 = vmatpush3.xpose.msk.msra.mxu1 %vm291_vm2, %v1364_v3  ;;  %1923 = vmatprep.mubr.msk.f32.mxu1 %vm2162_vm1, %v2161_v10 }
 0x78c   :  { %1931 = vmatprep.subr.mxu1 %v2161_v10  ;;  %1928 = vmatprep.mubr.msk.f32.mxu0 %vm2162_vm1, %v2161_v10 }
 0x78e   :  { %1924 = vmatmul.mubr.msk.f32.vlgmr.msra.gmra.mxu1 %vm291_vm2, %v1362_v6 }
 0x78f   :  { %1933 = vmatprep.mubr.msk.f32.mxu1 %vm2162_vm1, %v2161_v10 }
 0x846   :  { %v1203_v7 = vpop.f32.mrf.mxu0 }
 0x848   :  { %v1910_v8 = vpop.f32.mrf.mxu0 }
 0x84a   :  { %v1279_v9 = vpop.f32.mrf.mxu1  ;;  %v1357_v11 = vpop.f32.mrf.mxu0 }
 0x84b   :  { %v1439_v12 = vsel %vm2276_vm3, %v1357_v11, -1e+30 }
 0x84c   :  { %v1915_v13 = vpop.f32.mrf.mxu1  ;;  %v1920_v14 = vpop.f32.mrf.mxu0  ;;  %v1441_v15 = vsel %vm291_vm2, %v1439_v12, -inf }
 0x84d   :  { %1442 = vmax.xlane.f32.xlu0 %v1441_v15 }
 0x84e   :  { %v1435_v16 = vpop.f32.mrf.mxu1 }
 0x84f   :  { %v1440_v17 = vsel %vm2276_vm3, %v1435_v16, -1e+30 }
 0x850   :  { %v1925_v18 = vpop.f32.mrf.mxu1  ;;  %v1444_v19 = vsel %vm291_vm2, %v1440_v17, -inf }
 0x851   :  { %1445 = vmax.xlane.f32.xlu1 %v1444_v19 }
 0x862   :  { %1463 = vrot.lane.b32.xlu1 %v2258_v23, %s2173_s11 }
 0x866   :  { %1617 = vrot.lane.b32.xlu1 %v2348_v35, %s2156_s27 }
 0x86a   :  { %1619 = vrot.lane.b32.xlu1 %v2350_v37, %s2156_s27 }
 0x86e   :  { %1627 = vrot.lane.b32.xlu1 %v1279_v9, %s2174_s12 }
 0x8d6   :  { %v1443_v10 = vpop.xlane.xlu0 %1442 }
 0x8d7   :  { %v1447_v20 = vsub.f32 %v1439_v12, %v1443_v10 }
 0x8d9   :  { %v1449_v21 = vmul.f32 1.442695, %v1447_v20 }
 0x8da   :  { %v1446_v30 = vpop.xlane.xlu1 %1445 }
 0x8db   :  { %1995 = vpow2.f32 %v1449_v21  ;;  %v1448_v22 = vsub.f32 %v1440_v17, %v1446_v30 }
 0x8dd   :  { %v1451_v25 = vmul.f32 1.442695, %v1448_v22 }
 0x8de   :  { %v1464_v26 = vpop.permute.xlu1 %1463 }
 0x8df   :  { %1997 = vpow2.f32 %v1451_v25  ;;  %1927 = vmatpush3.msra.mxu0 %v1464_v26 }
 0x8e0   :  { %1936 = vmatprep.subr.mxu0 %v1650_v38 }
 0x8e2   :  { %v1618_v45 = vpop.permute.xlu1 %1617 }
 0x8e3   :  { %v1639_v48 = vsel %vm291_vm2, %v2312_v61, %v1618_v45 }
 0x8e6   :  { %v1620_v46 = vpop.permute.xlu1 %1619 }
 0x8e7   :  { %v1640_v53 = vsel %vm291_vm2, %v2314_v63, %v1620_v46 }
 0x8e8   :  { %v1996_v27 = vpop.eup %1995 }
 0x8e9   :  { %v1453_v23 = vsel %vm291_vm2, %v1996_v27, 0.0 }
 0x8ea   :  { %1454 = vadd.xlane.f32.xlu0 %v1453_v23  ;;  %v1628_v49 = vpop.permute.xlu1 %1627 }
 0x8eb   :  { %v1643_v54 = vsel %vm1641_vm5, %v1640_v53, %v1628_v49 }
 0x8ec   :  { %v1998_v28 = vpop.eup %1997 }
 0x8ed   :  { %v1456_v29 = vsel %vm291_vm2, %v1998_v28, 0.0 }
 0x8ee   :  { %1457 = vadd.xlane.f32.xlu0 %v1456_v29 }
 0x904   :  { %1539 = vrot.lane.b32.xlu0 %v2261_v24, %s2173_s11  ;;  %v1648_v24 = vld [vmem:[#allocation11 + $0x8] sm:$0xff] }
 0x908   :  { %1625 = vrot.lane.b32.xlu0 %v1203_v7, %s2174_s12 }
 0x973   :  { %v1455_v31 = vpop.xlane.xlu0 %1454 }
 0x974   :  { %1999 = vrcp.f32 %v1455_v31 }
 0x977   :  { %v1458_v32 = vpop.xlane.xlu0 %1457 }
 0x978   :  { %2001 = vrcp.f32 %v1458_v32 }
 0x97b   :  { %v1540_v33 = vpop.permute.xlu0 %1539 }
 0x97c   :  { %1932 = vmatpush3.msra.mxu1 %v1540_v33 }
 0x97f   :  { %v1626_v47 = vpop.permute.xlu0 %1625 }
 0x980   :  { %v1642_v50 = vsel %vm1641_vm5, %v1639_v48, %v1626_v47 }
 0x981   :  { %v2000_v34 = vpop.eup %1999 }
 0x982   :  { %v1460_v35 = vmul.f32 %v2000_v34, %v1996_v27 }
 0x984   :  { %1929 = vmatmul.mubr.msk.f32.vlgmr.msra.gmra.mxu0 %vm291_vm2, %v1460_v35 }
 0x985   :  { %v2002_v36 = vpop.eup %2001  ;;  %1937 = vmatpush3.msra.mxu0 %v1650_v38 }
 0x986   :  { %v1462_v37 = vmul.f32 %v2002_v36, %v1998_v28  ;;  %1938 = vmatprep.subr.mxu0 %v1649_v39 }
 0x987   :  { %1939 = vmatpush3.msra.mxu0 %v1649_v39 }
 0x988   :  { %1934 = vmatmul.mubr.msk.f32.vlgmr.msra.gmra.mxu1 %vm291_vm2, %v1462_v37  ;;  %1940 = vmatprep.subr.mxu0 %v1648_v24 }
 0x989   :  { %1941 = vmatpush3.msra.mxu0 %v1648_v24 }
 0x98a   :  { %1942 = vmatprep.subr.mxu0 %v1647_v40 }
 0x98b   :  { %1943 = vmatpush3.msra.mxu0 %v1647_v40 }
 0xa44   :  { %v1535_v41 = vpop.f32.mrf.mxu0 }
 0xa45   :  { %1633 = vrot.lane.b32.xlu0 %v1535_v41, %s2175_s1 }
 0xa46   :  { %v1930_v42 = vpop.f32.mrf.mxu0 }
 0xa48   :  { %v1611_v43 = vpop.f32.mrf.mxu1 }
 0xa49   :  { %1635 = vrot.lane.b32.xlu1 %v1611_v43, %s2175_s1 }
 0xa4a   :  { %v1935_v44 = vpop.f32.mrf.mxu1 }
 0xab7   :  { %v1634_v51 = vpop.permute.xlu0 %1633 }
 0xab8   :  { %v1645_v52 = vsel %vm1644_vm4, %v1642_v50, %v1634_v51 }
 0xab9   :  { %1944 = vmatprep.mubr.msk.f32.mxu0 %vm112_vm0, %v1645_v52 }
 0xabb   :  { %v1636_v55 = vpop.permute.xlu1 %1635 }
 0xabc   :  { %v1646_v56 = vsel %vm1644_vm4, %v1643_v54, %v1636_v55 }
 0xabd   :  { %1945 = vmatmul.mubr.msk.f32.vlgmr.msra.gmra.mxu0 %vm112_vm0, %v1646_v56 }
 0xb7d   :  { %v1946_v57 = vpop.f32.mrf.mxu0 }
 0xb7e   :  { %1733 = vst.msk [vmem:[#allocation13 + $0x8] sm:$0xff] %vm112_vm0, %v1946_v57 }
 0xb7f   :  { %v1723_v61 = vpop.f32.mrf.mxu0 }
 0xb80   :  { %1732 = vst.msk [vmem:[#allocation13] sm:$0xff] %vm112_vm0, %v1723_v61 }
 0xb81   :  { %2134 = shalt.err (!%p2131_p6)
}
 0xb82   :  { %1745 = dma.vmem_to_hbm [thread:$0]  %s1740_s14, 256, %s2420_s6, [#allocation4], %s2155_s26, %s2155_s26, %s2156_s27  }
 0xb83   :  { %2151 = dma.done.wait [#allocation4], 256  }
 0xb84   :  { %2152 = vsyncadd [#allocation4], 4294967040 }
 0xb85   :  { %1749 = vsyncpa [#allocation3], 1 }
 0xb86   :  { %1750 = vsyncpa [#allocation6], 1 }
 0xb87   :  { %1751 = vsyncpa [#allocation9], 1 }
 0xb88   :  { %1752 = vsyncpa [#allocation12], 1 }
 0xb89   :  { %1753 = vsyncpa [#allocation4], 1 }

</bundles_post_ra>
